<compile_context>
chip_gen: v7x
topology: tpu7x:2x2x1
jax: 0.10.0
libtpu: 0.0.40
codegen_flags: <defaults>
</compile_context>

<pallas_src>
import functools

import jax
import jax.numpy as jnp
from jax import lax
from jax.experimental import pallas as pl
from jax.experimental.pallas import tpu as pltpu


def _round_up(x, m):
    return ((x + m - 1) // m) * m


def _lse_kernel(w1_ref, et_ref, lse_ref, m_sc, l_sc, *,
                n_e_real, tile_n, tiles_per_shard, mask_cols):
    """Pass 1: per-shard online log-sum-exp of x = w1 @ E^T over streamed entity tiles."""
    s = pl.program_id(0)
    j = pl.program_id(1)

    @pl.when(j == 0)
    def _init():
        m_sc[...] = jnp.full(m_sc.shape, -jnp.inf, m_sc.dtype)
        l_sc[...] = jnp.zeros(l_sc.shape, l_sc.dtype)

    # (b_pad, d_e) @ (d_e, tile_n) -> lane-dense (b_pad, tile_n), f32 MXU accumulation.
    x = jnp.dot(w1_ref[...], et_ref[...], preferred_element_type=jnp.float32)

    if mask_cols:
        col = ((s * tiles_per_shard + j) * tile_n
               + lax.broadcasted_iota(jnp.int32, (1, tile_n), 1))
        valid = col < n_e_real
        x = jnp.where(valid, x, -1e30)          # mask only the statistics

    m_new = jnp.maximum(m_sc[...], jnp.max(x, axis=1, keepdims=True))
    p = jnp.exp(x - m_new)
    if mask_cols:
        p = jnp.where(valid, p, 0.0)            # exact even for fully-padded tiles
    alpha = jnp.exp(m_sc[...] - m_new)
    l_sc[...] = alpha * l_sc[...] + jnp.sum(p, axis=1, keepdims=True)
    m_sc[...] = m_new

    @pl.when(j == tiles_per_shard - 1)
    def _finalize():
        lse_ref[0] = m_sc[...] + jnp.log(l_sc[...])


def _pred_kernel(w1_ref, et_ref, lse_ref, pred_ref):
    """Pass 2: recompute logits tile and normalize directly (no stored-logits reload)."""
    x = jnp.dot(w1_ref[...], et_ref[...], preferred_element_type=jnp.float32)
    pred_ref[...] = jnp.exp(x - lse_ref[...])


def getd_forward(e1_idx, r_idx, E_w, R_w, Zlist, *, tile_n=2048, n_shards=2):
    """GETD forward: TR reconstruction + gather + BN + bilinear prologue in f32 XLA,
    the heavy scoring/softmax against all entities in two streamed Pallas passes."""
    n_e, d_e = E_w.shape
    d_r = R_w.shape[1]
    B = e1_idx.shape[0]
    eps = 1e-5

    # ---- tensor-ring reconstruction of the core tensor (k == 3) ----
    # TODO(synk): k=4 / k=5 TR contractions not wired up (same pattern, longer chain).
    W0 = jnp.einsum('aib,bjc,cka->ijk', Zlist[0], Zlist[1], Zlist[2])
    W = W0.reshape(d_e, d_r, d_e)

    # ---- tiny per-batch prologue hoisted to the wrapper, full f32 precision ----
    def bn_train(x):
        mu = jnp.mean(x, axis=0, keepdims=True)
        var = jnp.mean((x - mu) ** 2, axis=0, keepdims=True)   # biased var, like PyTorch BN
        return (x - mu) * lax.rsqrt(var + eps)

    e1n = bn_train(jnp.take(E_w, e1_idx, axis=0))   # bne(E(e1_idx)); input_dropout -> id
    rn = bn_train(jnp.take(R_w, r_idx, axis=0))     # bnr(R(r_idx))
    # W_mat1[b,k] = sum_{i,j} e1n[b,i] * rn[b,j] * W[i,j,k]  (hidden dropouts -> identity)
    acc = jnp.einsum('bi,bj,ijk->bk', e1n, rn, W)
    w1 = bn_train(acc)                               # bnw

    # ---- layout / padding ----
    b_pad = max(8, _round_up(B, 8))
    w1_bf = jnp.pad(w1, ((0, b_pad - B), (0, 0))).astype(jnp.bfloat16)

    tile_n = max(256, _round_up(tile_n, 256))
    tile_n = min(tile_n, _round_up(n_e, 256))
    n_tiles0 = pl.cdiv(n_e, tile_n)
    n_shards = n_shards if n_tiles0 >= 2 else 1
    tiles_per_shard = pl.cdiv(n_tiles0, n_shards)
    n_tiles = tiles_per_shard * n_shards
    n_e_pad = n_tiles * tile_n
    mask_cols = n_e_pad != n_e

    # K-major (transposed) bf16 E: the cast writes a fresh HBM array anyway, so the
    # transpose is ~free and keeps the MXU push / logits output lane-dense.
    e_t = jnp.pad(E_w.T, ((0, 0), (0, n_e_pad - n_e))).astype(jnp.bfloat16)

    # ---- VMEM budgets sized to what is actually double-buffered (+ margin) ----
    e_tile_b = tile_n * d_e * 2
    w1_b = b_pad * d_e * 2
    pred_tile_b = b_pad * tile_n * 4
    lse_b = b_pad * 4
    vmem1 = 2 * e_tile_b + 2 * w1_b + 2 * n_shards * lse_b + 4 * lse_b + (4 << 20)
    vmem2 = 2 * e_tile_b + 2 * pred_tile_b + 2 * w1_b + 2 * lse_b + (4 << 20)

    kernel1 = functools.partial(_lse_kernel, n_e_real=n_e, tile_n=tile_n,
                                tiles_per_shard=tiles_per_shard, mask_cols=mask_cols)

    # Pass 1: streamed per-shard log-sum-exp (no logits ever touch HBM).
    lse_shards = pl.pallas_call(
        kernel1,
        out_shape=jax.ShapeDtypeStruct((n_shards, b_pad, 1), jnp.float32),
        grid_spec=pltpu.PrefetchScalarGridSpec(
            num_scalar_prefetch=0,
            grid=(n_shards, tiles_per_shard),
            in_specs=[
                pl.BlockSpec((b_pad, d_e), lambda s, j: (0, 0)),           # w1, resident
                pl.BlockSpec((d_e, tile_n),
                             lambda s, j: (0, s * tiles_per_shard + j)),   # E^T tiles streamed
            ],
            out_specs=pl.BlockSpec((1, b_pad, 1), lambda s, j: (s, 0, 0)), # per-shard lse
            scratch_shapes=[pltpu.VMEM((b_pad, 1), jnp.float32),           # running max
                            pltpu.VMEM((b_pad, 1), jnp.float32)]),         # running sum(exp)
        compiler_params=pltpu.CompilerParams(
            dimension_semantics=("parallel", "arbitrary"),   # shards -> both TCs on v7x
            vmem_limit_bytes=int(vmem1)),
    )(w1_bf, e_t)

    # Combine per-shard LSEs (exact logaddexp over the shard axis) -> (b_pad, 1).
    if n_shards > 1:
        m = jnp.max(lse_shards, axis=0)
        lse = m + jnp.log(jnp.sum(jnp.exp(lse_shards - m), axis=0))
    else:
        lse = lse_shards[0]

    # Pass 2: recompute logits per tile and normalize; fully parallel over entity tiles.
    pred_pad = pl.pallas_call(
        _pred_kernel,
        out_shape=jax.ShapeDtypeStruct((b_pad, n_e_pad), jnp.float32),
        grid_spec=pltpu.PrefetchScalarGridSpec(
            num_scalar_prefetch=0,
            grid=(n_tiles,),
            in_specs=[
                pl.BlockSpec((b_pad, d_e), lambda j: (0, 0)),   # w1, resident
                pl.BlockSpec((d_e, tile_n), lambda j: (0, j)),  # E^T tiles streamed
                pl.BlockSpec((b_pad, 1), lambda j: (0, 0)),     # lse, resident
            ],
            out_specs=pl.BlockSpec((b_pad, tile_n), lambda j: (0, j))),
        compiler_params=pltpu.CompilerParams(
            dimension_semantics=("parallel",),
            vmem_limit_bytes=int(vmem2)),
    )(w1_bf, e_t, lse)

    pred = pred_pad[:B, :n_e]
    return pred, W


if __name__ == "__main__":
    key = jax.random.PRNGKey(0)
    n_entities, n_relations = 32, 16
    d_e = d_r = 16
    ranks, ni, k = 4, 16, 3                  # ni**3 == d_e * d_r * d_e
    B = 8

    k1, k2, k3, k4, k5, k6, k7 = jax.random.split(key, 7)
    E_w = 0.001 * jax.random.normal(k1, (n_entities, d_e), dtype=jnp.float32)
    R_w = 0.001 * jax.random.normal(k2, (n_relations, d_r), dtype=jnp.float32)
    Zlist = [jax.random.uniform(kk, (ranks, ni, ranks), jnp.float32, -0.1, 0.1)
             for kk in (k3, k4, k5)]
    e1_idx = jax.random.randint(k6, (B,), 0, n_entities)
    r_idx = jax.random.randint(k7, (B,), 0, n_relations)

    pred, W = jax.jit(getd_forward)(e1_idx, r_idx, E_w, R_w, Zlist)
    jax.block_until_ready((pred, W))

    assert pred.shape == (B, n_entities)
    assert W.shape == (d_e, d_r, d_e)
    assert bool(jnp.all(jnp.isfinite(pred)))
    assert bool(jnp.allclose(jnp.sum(pred, axis=1), 1.0, atol=1e-4))
    print("KERNEL_OK")
</pallas_src>

<mosaic_0001>
module attributes {stable_mosaic.version = 11 : i64} {
  func.func @_lse_kernel(%arg0: i32, %arg1: i32, %arg2: memref<8x16xbf16, #tpu.memory_space<vmem>>, %arg3: memref<16x256xbf16, #tpu.memory_space<vmem>>, %arg4: memref<1x8x1xf32, #tpu.memory_space<vmem>>, %arg5: memref<8x1xf32, #tpu.memory_space<vmem>>, %arg6: memref<8x1xf32, #tpu.memory_space<vmem>>) attributes {dimension_semantics = [#tpu.dimension_semantics<parallel>, #tpu.dimension_semantics<arbitrary>], iteration_bounds = array<i64: 1, 1>, scalar_prefetch = 0 : i64, scratch_operands = 2 : i64, tpu.core_type = #tpu.core_type<tc>, window_params = [{pipeline_mode = #tpu.pipeline_mode<synchronous>, transform_indices = @transform_0, window_bounds = array<i64: 8, 16>}, {transform_indices = @transform_1, window_bounds = array<i64: 16, 256>}, {transform_indices = @transform_2, window_bounds = array<i64: 1, 8, 1>}]} {
    %c0_i32 = arith.constant 0 : i32
    %0 = arith.cmpi eq, %arg1, %c0_i32 : i32
    %1 = arith.extui %0 : i1 to i32
    %c0_i32_0 = arith.constant 0 : i32
    %2 = arith.cmpi ne, %1, %c0_i32_0 : i32
    scf.if %2 {
      %cst_20 = arith.constant 0xFF800000 : f32
      %42 = vector.broadcast %cst_20 : f32 to vector<8x1xf32>
      %c0_21 = arith.constant 0 : index
      %c0_22 = arith.constant 0 : index
      %43 = vector.load %arg5[%c0_21, %c0_22] : memref<8x1xf32, #tpu.memory_space<vmem>>, vector<8x1xf32>
      tpu.vector_store %arg5[%c0_21, %c0_22], %42 {strides = array<i32>} : memref<8x1xf32, #tpu.memory_space<vmem>>, vector<8x1xf32>,
      %cst_23 = arith.constant 0.000000e+00 : f32
      %44 = vector.broadcast %cst_23 : f32 to vector<8x1xf32>
      %c0_24 = arith.constant 0 : index
      %c0_25 = arith.constant 0 : index
      %45 = vector.load %arg6[%c0_24, %c0_25] : memref<8x1xf32, #tpu.memory_space<vmem>>, vector<8x1xf32>
      tpu.vector_store %arg6[%c0_24, %c0_25], %44 {strides = array<i32>} : memref<8x1xf32, #tpu.memory_space<vmem>>, vector<8x1xf32>,
    } else {
    }
    %c0 = arith.constant 0 : index
    %c0_1 = arith.constant 0 : index
    %3 = vector.load %arg2[%c0, %c0_1] : memref<8x16xbf16, #tpu.memory_space<vmem>>, vector<8x16xbf16>
    %c0_2 = arith.constant 0 : index
    %c0_3 = arith.constant 0 : index
    %4 = vector.load %arg3[%c0_2, %c0_3] : memref<16x256xbf16, #tpu.memory_space<vmem>>, vector<16x256xbf16>
    %cst = arith.constant dense<0.000000e+00> : vector<8x256xf32>
    %5 = tpu.matmul %3, %4, %cst {dimension_numbers = #tpu.dot_dimension_numbers<[1], [0], [0], [1], [0, 0, 1, 1], [], []>} : vector<8x16xbf16>, vector<16x256xbf16>, vector<8x256xf32> -> vector<8x256xf32>
    %c1_i32 = arith.constant 1 : i32
    %6 = arith.muli %arg0, %c1_i32 : i32
    %7 = arith.addi %6, %arg1 : i32
    %c256_i32 = arith.constant 256 : i32
    %8 = arith.muli %7, %c256_i32 : i32
    %9 = tpu.iota {dimensions = array<i32: 1>} : vector<1x256xi32>
    %10 = vector.broadcast %8 : i32 to vector<1x256xi32>
    %11 = arith.addi %10, %9 : vector<1x256xi32>
    %c32_i32 = arith.constant 32 : i32
    %12 = vector.broadcast %c32_i32 : i32 to vector<1x256xi32>
    %13 = arith.cmpi slt, %11, %12 : vector<1x256xi32>
    %cst_4 = arith.constant -1.000000e+30 : f32
    %14 = vector.shape_cast %13 : vector<1x256xi1> to vector<1x256xi1>
    %15 = vector.broadcast %14 : vector<1x256xi1> to vector<8x256xi1>
    %16 = vector.broadcast %cst_4 : f32 to vector<8x256xf32>
    %17 = arith.select %15, %5, %16 : vector<8x256xi1>, vector<8x256xf32>
    %c0_5 = arith.constant 0 : index
    %c0_6 = arith.constant 0 : index
    %18 = vector.load %arg5[%c0_5, %c0_6] : memref<8x1xf32, #tpu.memory_space<vmem>>, vector<8x1xf32>
    %cst_7 = arith.constant dense<0xFF800000> : vector<8xf32>
    %19 = vector.multi_reduction <maximumf>, %17, %cst_7 [1] : vector<8x256xf32> to vector<8xf32>
    %20 = vector.shape_cast %19 : vector<8xf32> to vector<8x1xf32>
    %21 = arith.maximumf %18, %20 : vector<8x1xf32>
    %22 = vector.broadcast %21 : vector<8x1xf32> to vector<8x256xf32>
    %23 = arith.subf %17, %22 : vector<8x256xf32>
    %24 = math.exp %23 : vector<8x256xf32>
    %cst_8 = arith.constant 0.000000e+00 : f32
    %25 = vector.shape_cast %13 : vector<1x256xi1> to vector<1x256xi1>
    %26 = vector.broadcast %25 : vector<1x256xi1> to vector<8x256xi1>
    %27 = vector.broadcast %cst_8 : f32 to vector<8x256xf32>
    %28 = arith.select %26, %24, %27 : vector<8x256xi1>, vector<8x256xf32>
    %c0_9 = arith.constant 0 : index
    %c0_10 = arith.constant 0 : index
    %29 = vector.load %arg5[%c0_9, %c0_10] : memref<8x1xf32, #tpu.memory_space<vmem>>, vector<8x1xf32>
    %30 = arith.subf %29, %21 : vector<8x1xf32>
    %31 = math.exp %30 : vector<8x1xf32>
    %c0_11 = arith.constant 0 : index
    %c0_12 = arith.constant 0 : index
    %32 = vector.load %arg6[%c0_11, %c0_12] : memref<8x1xf32, #tpu.memory_space<vmem>>, vector<8x1xf32>
    %33 = arith.mulf %31, %32 : vector<8x1xf32>
    %cst_13 = arith.constant dense<0.000000e+00> : vector<8xf32>
    %34 = vector.multi_reduction <add>, %28, %cst_13 [1] : vector<8x256xf32> to vector<8xf32>
    %35 = vector.shape_cast %34 : vector<8xf32> to vector<8x1xf32>
    %36 = arith.addf %33, %35 : vector<8x1xf32>
    %c0_14 = arith.constant 0 : index
    %c0_15 = arith.constant 0 : index
    %37 = vector.load %arg6[%c0_14, %c0_15] : memref<8x1xf32, #tpu.memory_space<vmem>>, vector<8x1xf32>
    tpu.vector_store %arg6[%c0_14, %c0_15], %36 {strides = array<i32>} : memref<8x1xf32, #tpu.memory_space<vmem>>, vector<8x1xf32>,
    %c0_16 = arith.constant 0 : index
    %c0_17 = arith.constant 0 : index
    %38 = vector.load %arg5[%c0_16, %c0_17] : memref<8x1xf32, #tpu.memory_space<vmem>>, vector<8x1xf32>
    tpu.vector_store %arg5[%c0_16, %c0_17], %21 {strides = array<i32>} : memref<8x1xf32, #tpu.memory_space<vmem>>, vector<8x1xf32>,
    %c0_i32_18 = arith.constant 0 : i32
    %39 = arith.cmpi eq, %arg1, %c0_i32_18 : i32
    %40 = arith.extui %39 : i1 to i32
    %c0_i32_19 = arith.constant 0 : i32
    %41 = arith.cmpi ne, %40, %c0_i32_19 : i32
    scf.if %41 {
      %c0_20 = arith.constant 0 : index
      %c0_21 = arith.constant 0 : index
      %42 = vector.load %arg5[%c0_20, %c0_21] : memref<8x1xf32, #tpu.memory_space<vmem>>, vector<8x1xf32>
      %c0_22 = arith.constant 0 : index
      %c0_23 = arith.constant 0 : index
      %43 = vector.load %arg6[%c0_22, %c0_23] : memref<8x1xf32, #tpu.memory_space<vmem>>, vector<8x1xf32>
      %44 = math.log %43 : vector<8x1xf32>
      %45 = arith.addf %42, %44 : vector<8x1xf32>
      %c0_24 = arith.constant 0 : index
      %c0_25 = arith.constant 0 : index
      %c0_26 = arith.constant 0 : index
      %46 = vector.load %arg4[%c0_24, %c0_25, %c0_26] : memref<1x8x1xf32, #tpu.memory_space<vmem>>, vector<1x8x1xf32>
      %47 = vector.shape_cast %46 : vector<1x8x1xf32> to vector<8x1xf32>
      %48 = vector.shape_cast %45 : vector<8x1xf32> to vector<1x8x1xf32>
      tpu.vector_store %arg4[%c0_24, %c0_25, %c0_26], %48 {strides = array<i32>} : memref<1x8x1xf32, #tpu.memory_space<vmem>>, vector<1x8x1xf32>,
    } else {
    }
    return
  }
  func.func @transform_0(%arg0: i32, %arg1: i32) -> (i32, i32) {
    %c0_i32 = arith.constant 0 : i32
    %c0_i32_0 = arith.constant 0 : i32
    %c0_i32_1 = arith.constant 0 : i32
    return %c0_i32, %c0_i32_0 : i32, i32
  }
  func.func @transform_1(%arg0: i32, %arg1: i32) -> (i32, i32) {
    %c1_i32 = arith.constant 1 : i32
    %0 = arith.muli %arg0, %c1_i32 : i32
    %1 = arith.addi %0, %arg1 : i32
    %c0_i32 = arith.constant 0 : i32
    %c0_i32_0 = arith.constant 0 : i32
    return %c0_i32, %1 : i32, i32
  }
  func.func @transform_2(%arg0: i32, %arg1: i32) -> (i32, i32, i32) {
    %c0_i32 = arith.constant 0 : i32
    %c0_i32_0 = arith.constant 0 : i32
    %c0_i32_1 = arith.constant 0 : i32
    return %arg0, %c0_i32, %c0_i32_0 : i32, i32, i32
  }
}

module attributes {stable_mosaic.version = 11 : i64} {
  func.func @_pred_kernel(%arg0: i32, %arg1: memref<8x16xbf16, #tpu.memory_space<vmem>>, %arg2: memref<16x256xbf16, #tpu.memory_space<vmem>>, %arg3: memref<8x1xf32, #tpu.memory_space<vmem>>, %arg4: memref<8x256xf32, #tpu.memory_space<vmem>>) attributes {dimension_semantics = [#tpu.dimension_semantics<parallel>], iteration_bounds = array<i64: 1>, scalar_prefetch = 0 : i64, scratch_operands = 0 : i64, tpu.core_type = #tpu.core_type<tc>, window_params = [{pipeline_mode = #tpu.pipeline_mode<synchronous>, transform_indices = @transform_0, window_bounds = array<i64: 8, 16>}, {transform_indices = @transform_1, window_bounds = array<i64: 16, 256>}, {pipeline_mode = #tpu.pipeline_mode<synchronous>, transform_indices = @transform_2, window_bounds = array<i64: 8, 1>}, {transform_indices = @transform_3, window_bounds = array<i64: 8, 256>}]} {
    %c0 = arith.constant 0 : index
    %c0_0 = arith.constant 0 : index
    %0 = vector.load %arg1[%c0, %c0_0] : memref<8x16xbf16, #tpu.memory_space<vmem>>, vector<8x16xbf16>
    %c0_1 = arith.constant 0 : index
    %c0_2 = arith.constant 0 : index
    %1 = vector.load %arg2[%c0_1, %c0_2] : memref<16x256xbf16, #tpu.memory_space<vmem>>, vector<16x256xbf16>
    %cst = arith.constant dense<0.000000e+00> : vector<8x256xf32>
    %2 = tpu.matmul %0, %1, %cst {dimension_numbers = #tpu.dot_dimension_numbers<[1], [0], [0], [1], [0, 0, 1, 1], [], []>} : vector<8x16xbf16>, vector<16x256xbf16>, vector<8x256xf32> -> vector<8x256xf32>
    %c0_3 = arith.constant 0 : index
    %c0_4 = arith.constant 0 : index
    %3 = vector.load %arg3[%c0_3, %c0_4] : memref<8x1xf32, #tpu.memory_space<vmem>>, vector<8x1xf32>
    %4 = vector.broadcast %3 : vector<8x1xf32> to vector<8x256xf32>
    %5 = arith.subf %2, %4 : vector<8x256xf32>
    %6 = math.exp %5 : vector<8x256xf32>
    %c0_5 = arith.constant 0 : index
    %c0_6 = arith.constant 0 : index
    %7 = vector.load %arg4[%c0_5, %c0_6] : memref<8x256xf32, #tpu.memory_space<vmem>>, vector<8x256xf32>
    tpu.vector_store %arg4[%c0_5, %c0_6], %6 {strides = array<i32>} : memref<8x256xf32, #tpu.memory_space<vmem>>, vector<8x256xf32>,
    return
  }
  func.func @transform_0(%arg0: i32) -> (i32, i32) {
    %c0_i32 = arith.constant 0 : i32
    %c0_i32_0 = arith.constant 0 : i32
    %c0_i32_1 = arith.constant 0 : i32
    return %c0_i32, %c0_i32_0 : i32, i32
  }
  func.func @transform_1(%arg0: i32) -> (i32, i32) {
    %c0_i32 = arith.constant 0 : i32
    %c0_i32_0 = arith.constant 0 : i32
    return %c0_i32, %arg0 : i32, i32
  }
  func.func @transform_2(%arg0: i32) -> (i32, i32) {
    %c0_i32 = arith.constant 0 : i32
    %c0_i32_0 = arith.constant 0 : i32
    %c0_i32_1 = arith.constant 0 : i32
    return %c0_i32, %c0_i32_0 : i32, i32
  }
  func.func @transform_3(%arg0: i32) -> (i32, i32) {
    %c0_i32 = arith.constant 0 : i32
    %c0_i32_0 = arith.constant 0 : i32
    return %c0_i32, %arg0 : i32, i32
  }
}

</mosaic_0001>

<bundles_post_ra>
// kernel: getd_forward.2
= control target key start
LH: loop header
LB: loop body
LE: loop exit
PB: predicated region body
PF: predicated region fallthrough
CT: control target
= control target key end

     0   :  { %v180_v1 = vmov 0   ;;  %vm54_vm0 = vcmask 130048   ;;  %vm38_vm1 = vcmask 7168   ;;  %v181_v4 = vmov -inf   ;;  %s217_s1 = inlined_call_operand.vmem [shape: bf16[16,256], index: 1, kind: input, shape index: {}]   ;;  %s218_s0 = inlined_call_operand.vmem [shape: bf16[8,16], index: 0, kind: input, shape index: {}]   ;;  %s219_s2 = inlined_call_operand.vmem [shape: f32[1,8,1], index: 2, kind: output, shape index: {}]  }
   0x1   :  { %v171_v0 = vld [vmem:[%s217_s1 + $0x4] ss:$8 sps:$4 sm:$0xff]   ;;  %90 = vmatprep.mubr.bf16.mxu0 %v180_v1  ;;  %170 = vset.pattern.permute.xlu0 %v180_v1  ;;  %v173_v2 = vld [vmem:[%s217_s1] ss:$8 sps:$4 sm:$0xff]   ;;  %39 = vst.msk [vmem:[#allocation2] sm:$0xff] %vm38_vm1, %v181_v4  ;;  %v101_v5 = vlaneseq  ;;  %v182_v13 = vmov 0.0  }
   0x2   :  { %58 = vmatprep.subr.bf16.mxu0 %v171_v0  ;;  %v41_v3 = vld [vmem:[%s218_s0] sm:$0xf]  ;;  %40 = vst.msk [vmem:[#allocation3] sm:$0xff] %vm38_vm1, %v182_v13 }
   0x3   :  { %59 = vmatpush1.bf16.msra.mxu0 %v173_v2  ;;  %v102_v6 = vand.u32 127, %v101_v5 }
   0x5   :  { %vm107_vm2 = vcmp.lt.s32.totalorder %v102_v6, 32 }
   0x6   :  { %166 = vmatmul.mubr.msk.bf16.vlgmr.msra.gmra.mrb[0].mxu0 %vm54_vm0, %v41_v3 }
   0x8   :  { %v115_v14 = vld [vmem:[#allocation2] sm:$0xff] }
   0x9   :  { %v136_v25 = vld [vmem:[#allocation3] sm:$0xff] }
  0xd9   :  { %v92_v7 = vpop.f32.mrb[0].mxu0 }
  0xda   :  { %v113_v8 = vsel %vm107_vm2, %v92_v7, -1e+30  ;;  %v94_v9 = vpop.f32.mrb[1].mxu0 }
  0xdb   :  { %v96_v10 = vpop.f32.mrb[2].mxu0  ;;  %v116_v11 = vmax.f32 %v113_v8, -1e+30 }
  0xdc   :  { %v97_v12 = vpop.f32.mrb[3].mxu0 }
  0xdd   :  { %117 = vmax.xlane.f32.xlu0 %v116_v11 }
 0x16a   :  { %v118_v15 = vpop.xlane.xlu0 %117 }
 0x16b   :  { %v119_v16 = vmax.f32 %v115_v14, %v118_v15 }
 0x16d   :  { %v133_v17 = vsub.f32 %v115_v14, %v119_v16  ;;  %144 = vst.msk [vmem:[#allocation2] sm:$0xff] %vm38_vm1, %v119_v16  ;;  %122 = vperm.xlu0 %170, %v119_v16  }
 0x16f   :  { %v134_v23 = vmul.f32 1.442695, %v133_v17 }
 0x174   :  { %v148_v32 = vld [vmem:[#allocation2] sm:$0xff] }
 0x1ec   :  { %v123_v18 = vpop.permute.xlu0 %122 }
 0x1ed   :  { %v125_v19 = vsub.f32 %v113_v8, %v123_v18 }
 0x1ef   :  { %v127_v20 = vmul.f32 1.442695, %v125_v19 }
 0x1f1   :  { %174 = vpow2.f32 %v127_v20 }
 0x1f2   :  { %176 = vpow2.f32 %v134_v23 }
 0x1fb   :  { %v175_v21 = vpop.eup %174 }
 0x1fc   :  { %v131_v22 = vsel %vm107_vm2, %v175_v21, 0.0  ;;  %v177_v24 = vpop.eup %176 }
 0x1fd   :  { %139 = vadd.xlane.f32.xlu1 %v131_v22  ;;  %v137_v26 = vmul.f32 %v177_v24, %v136_v25 }
 0x28a   :  { %v140_v27 = vpop.xlane.xlu1 %139 }
 0x28b   :  { %v141_v28 = vadd.f32 %v140_v27, %v137_v26 }
 0x28d   :  { %143 = vst.msk [vmem:[#allocation3] sm:$0xff] %vm38_vm1, %v141_v28 }
 0x294   :  { %v149_v29 = vld [vmem:[#allocation3] sm:$0xff] }
 0x295   :  { %178 = vlog2.f32 %v149_v29 }
 0x29f   :  { %v179_v30 = vpop.eup %178 }
 0x2a0   :  { %v151_v31 = vmul.f32 0.6931472, %v179_v30 }
 0x2a2   :  { %v152_v33 = vadd.f32 %v151_v31, %v148_v32 }
 0x2a4   :  { %153 = vst.msk [vmem:[%s219_s2] sm:$0xff] %vm38_vm1, %v152_v33 }

// kernel: getd_forward.3
= control target key start
LH: loop header
LB: loop body
LE: loop exit
PB: predicated region body
PF: predicated region fallthrough
CT: control target
= control target key end

     0   :  { %v103_v1 = vmov 0   ;;  %vm28_vm0 = vcmask 130048   ;;  %s142_s1 = inlined_call_operand.vmem [shape: bf16[16,256], index: 1, kind: input, shape index: {}]   ;;  %s143_s2 = inlined_call_operand.vmem [shape: f32[8,1], index: 2, kind: input, shape index: {}]   ;;  %s144_s0 = inlined_call_operand.vmem [shape: bf16[8,16], index: 0, kind: input, shape index: {}]   ;;  %s145_s3 = inlined_call_operand.vmem [shape: f32[8,256], index: 3, kind: output, shape index: {}]  }
   0x1   :  { %v96_v0 = vld [vmem:[%s142_s1 + $0x4] ss:$8 sps:$4 sm:$0xff]   ;;  %64 = vmatprep.mubr.bf16.mxu0 %v103_v1  ;;  %95 = vset.pattern.permute.xlu0 %v103_v1  ;;  %v98_v2 = vld [vmem:[%s142_s1] ss:$8 sps:$4 sm:$0xff]  }
   0x2   :  { %v73_v3 = vld [vmem:[%s143_s2] sm:$0xff]  ;;  %32 = vmatprep.subr.bf16.mxu0 %v96_v0 }
   0x3   :  { %76 = vperm.xlu0 %95, %v73_v3   ;;  %33 = vmatpush1.bf16.msra.mxu0 %v98_v2  ;;  %v15_v4 = vld [vmem:[%s144_s0] sm:$0xf] }
   0x6   :  { %93 = vmatmul.mubr.msk.bf16.vlgmr.msra.gmra.mrb[0].mxu0 %vm28_vm0, %v15_v4 }
  0x82   :  { %v77_v5 = vpop.permute.xlu0 %76 }
  0xd9   :  { %v66_v6 = vpop.f32.mrb[0].mxu0 }
  0xda   :  { %v79_v7 = vsub.f32 %v66_v6, %v77_v5  ;;  %v68_v8 = vpop.f32.mrb[1].mxu0 }
  0xdb   :  { %v80_v9 = vsub.f32 %v68_v8, %v77_v5  ;;  %v70_v10 = vpop.f32.mrb[2].mxu0 }
  0xdc   :  { %v81_v11 = vmul.f32 1.442695, %v79_v7  ;;  %v71_v12 = vpop.f32.mrb[3].mxu0 }
  0xdd   :  { %v83_v13 = vmul.f32 1.442695, %v80_v9 }
  0xde   :  { %99 = vpow2.f32 %v81_v11 }
  0xdf   :  { %101 = vpow2.f32 %v83_v13 }
  0xe8   :  { %v100_v14 = vpop.eup %99 }
  0xe9   :  { %v102_v15 = vpop.eup %101  ;;  %85 = vst [vmem:[%s145_s3] sm:$0xff] %v100_v14 }
  0xea   :  { %86 = vst [vmem:[%s145_s3 + $0x8] sm:$0xff] %v102_v15 }

</bundles_post_ra>
